<compile_context>
chip_gen: v6e
topology: v6e:2x2x1
jax: 0.10.0
libtpu: 0.0.40
codegen_flags: <defaults>
</compile_context>

<pallas_src>
import jax
import jax.numpy as jnp
from jax.experimental import pallas as pl
from jax.experimental.pallas import tpu as pltpu


NUM_LAYERS = 5


def _lstm_layer_kernel(x_ref, wih0_ref, wihr_ref, whh_ref, b_ref,
                       hlast_ref, seq_scr, gin_scr):
    """One grid step == one LSTM layer over the whole sequence (layer-major).

    x_ref    : (T*B, I)      time-major input flattened over (T, B); used at layer 0 only
    wih0_ref : (I, 4H)       layer-0 input weights
    wihr_ref : (1, H, 4H)    current layer's input weights (layers 1..4; dummy view at l=0)
    whh_ref  : (1, H, 4H)    current layer's recurrent weights (streamed per layer)
    b_ref    : (1, 1, 4H)    current layer's combined bias (b_ih + b_hh)
    hlast_ref: (B, H)        output: top layer's hidden state at the last time step
    seq_scr  : (T*B, H)      persistent scratch: previous layer's output sequence (read for
                             the projection), then overwritten with this layer's outputs
    gin_scr  : (T*B, 4H)     scratch: hoisted input projection for all time steps
    """
    l = pl.program_id(0)
    TB, H = seq_scr.shape
    B = hlast_ref.shape[0]
    T = TB // B
    bias = b_ref[0]                                   # (1, 4H)

    # --- 1) Hoisted input projection: ONE big MXU matmul covering all T time steps. ---
    @pl.when(l == 0)
    def _proj_layer0():
        gin_scr[...] = (jnp.dot(x_ref[...], wih0_ref[...],
                                preferred_element_type=jnp.float32) + bias)

    @pl.when(l > 0)
    def _proj_upper():
        gin_scr[...] = (jnp.dot(seq_scr[...], wihr_ref[0],
                                preferred_element_type=jnp.float32) + bias)

    # --- 2) Sequential recurrence: only the (B,H)x(H,4H) matmul stays per step. ---
    w_hh = whh_ref[0]                                 # (H, 4H)
    h = jnp.zeros((B, H), jnp.float32)
    c = jnp.zeros((B, H), jnp.float32)
    # TODO(synk): for long sequences switch to lax.fori_loop over 3-D (T,B,.) scratch;
    # the static unrolled loop keeps every slice static for small T.
    for t in range(T):
        gates = (gin_scr[pl.ds(t * B, B), :]
                 + jnp.dot(h, w_hh, preferred_element_type=jnp.float32))   # (B, 4H)
        i_g = jax.nn.sigmoid(gates[:, 0 * H:1 * H])
        f_g = jax.nn.sigmoid(gates[:, 1 * H:2 * H])
        g_g = jnp.tanh(gates[:, 2 * H:3 * H])
        o_g = jax.nn.sigmoid(gates[:, 3 * H:4 * H])
        c = f_g * c + i_g * g_g
        h = o_g * jnp.tanh(c)
        seq_scr[pl.ds(t * B, B), :] = h               # feeds next layer's projection

    # Constant output index_map: writeback deferred, only the layer-4 value reaches HBM.
    hlast_ref[...] = h.astype(hlast_ref.dtype)


@jax.jit
def five_layer_lstm_net(x_bit, wih0, wih_rest, whh, b, wfc, bfc):
    """x_bit: (batch, input_size, seq_len), exactly like the PyTorch module's input."""
    x = jnp.transpose(x_bit, (2, 0, 1)).astype(jnp.float32)   # (T, B, I) time-major
    T, B, I = x.shape
    H = whh.shape[1]
    x2d = x.reshape(T * B, I)                                 # 2-D slab; reshape is free in XLA
    b3 = b.reshape(NUM_LAYERS, 1, 4 * H)                      # 3-D so the block equals full dims

    h_last = pl.pallas_call(
        _lstm_layer_kernel,
        out_shape=jax.ShapeDtypeStruct((B, H), jnp.float32),
        grid_spec=pltpu.PrefetchScalarGridSpec(
            num_scalar_prefetch=0,
            grid=(NUM_LAYERS,),
            in_specs=[
                pl.BlockSpec((T * B, I), lambda l: (0, 0)),                 # x (layer 0 only)
                pl.BlockSpec((I, 4 * H), lambda l: (0, 0)),                 # W_ih layer 0
                pl.BlockSpec((1, H, 4 * H),
                             lambda l: (jnp.maximum(l - 1, 0), 0, 0)),      # W_ih layers 1..4
                pl.BlockSpec((1, H, 4 * H), lambda l: (l, 0, 0)),           # W_hh (streamed)
                pl.BlockSpec((1, 1, 4 * H), lambda l: (l, 0, 0)),           # bias (streamed)
            ],
            out_specs=pl.BlockSpec((B, H), lambda l: (0, 0)),
            scratch_shapes=[
                pltpu.VMEM((T * B, H), jnp.float32),        # per-layer output sequence
                pltpu.VMEM((T * B, 4 * H), jnp.float32),    # hoisted input projection
            ],
        ),
        compiler_params=pltpu.CompilerParams(
            dimension_semantics=("arbitrary",)),   # layers are sequentially dependent
    )(x2d, wih0, wih_rest, whh, b3)

    # Final Linear on the last time step of the top layer (tiny (H,O) matmul in XLA).
    return h_last @ wfc + bfc


def reference_forward(x_bit, wih0, wih_rest, whh, b, wfc, bfc):
    """Pure-JAX reference implementing the same math (correctness check)."""
    x = jnp.transpose(x_bit, (2, 0, 1)).astype(jnp.float32)
    T, B, I = x.shape
    H = whh.shape[1]
    h = jnp.zeros((NUM_LAYERS, B, H), jnp.float32)
    c = jnp.zeros((NUM_LAYERS, B, H), jnp.float32)
    inp = None
    for t in range(T):
        inp = x[t]
        hs, cs = [], []
        for l in range(NUM_LAYERS):
            w_ih = wih0 if l == 0 else wih_rest[l - 1]
            gates = inp @ w_ih + h[l] @ whh[l] + b[l]
            i_g = jax.nn.sigmoid(gates[:, 0 * H:1 * H])
            f_g = jax.nn.sigmoid(gates[:, 1 * H:2 * H])
            g_g = jnp.tanh(gates[:, 2 * H:3 * H])
            o_g = jax.nn.sigmoid(gates[:, 3 * H:4 * H])
            c_new = f_g * c[l] + i_g * g_g
            h_new = o_g * jnp.tanh(c_new)
            hs.append(h_new)
            cs.append(c_new)
            inp = h_new
        h = jnp.stack(hs)
        c = jnp.stack(cs)
    return inp @ wfc + bfc


def make_params(key, input_size, hidden_size, output_dim):
    """Deterministic synthetic parameters (PyTorch-style uniform(-1/sqrt(H), 1/sqrt(H)))."""
    H = hidden_size
    k = 1.0 / jnp.sqrt(jnp.asarray(H, jnp.float32))
    keys = jax.random.split(key, 8)
    u = lambda kk, shape: jax.random.uniform(kk, shape, jnp.float32, -k, k)
    wih0 = u(keys[0], (input_size, 4 * H))
    wih_rest = u(keys[1], (NUM_LAYERS - 1, H, 4 * H))
    whh = u(keys[2], (NUM_LAYERS, H, 4 * H))
    b_ih = u(keys[3], (NUM_LAYERS, 4 * H))
    b_hh = u(keys[4], (NUM_LAYERS, 4 * H))
    b = b_ih + b_hh
    wfc = u(keys[5], (H, output_dim))
    bfc = u(keys[6], (1, output_dim))
    return wih0, wih_rest, whh, b, wfc, bfc


if __name__ == "__main__":
    # Small shapes consistent with the module's forward: x is (batch, input_size, seq_len)
    batch, input_size, seq_len = 2, 16, 8
    hidden_size, output_dim = 32, 8

    key = jax.random.PRNGKey(0)
    k_x, k_p = jax.random.split(key)
    x = jax.random.normal(k_x, (batch, input_size, seq_len), jnp.float32)
    params = make_params(k_p, input_size, hidden_size, output_dim)

    out = five_layer_lstm_net(x, *params)
    out = jax.block_until_ready(out)

    ref = reference_forward(x, *params)
    assert out.shape == (batch, output_dim), out.shape
    assert jnp.allclose(out, ref, rtol=1e-2, atol=1e-2), (
        f"max abs diff {jnp.max(jnp.abs(out - ref))}")

    print("KERNEL_OK")
</pallas_src>

<mosaic_0001>
module attributes {stable_mosaic.version = 11 : i64} {
  func.func @_lstm_layer_kernel(%arg0: i32, %arg1: memref<16x16xf32, #tpu.memory_space<vmem>>, %arg2: memref<16x128xf32, #tpu.memory_space<vmem>>, %arg3: memref<1x32x128xf32, #tpu.memory_space<vmem>>, %arg4: memref<1x32x128xf32, #tpu.memory_space<vmem>>, %arg5: memref<1x1x128xf32, #tpu.memory_space<vmem>>, %arg6: memref<2x32xf32, #tpu.memory_space<vmem>>, %arg7: memref<16x32xf32, #tpu.memory_space<vmem>>, %arg8: memref<16x128xf32, #tpu.memory_space<vmem>>) attributes {dimension_semantics = [#tpu.dimension_semantics<arbitrary>], iteration_bounds = array<i64: 5>, scalar_prefetch = 0 : i64, scratch_operands = 2 : i64, tpu.core_type = #tpu.core_type<tc>, window_params = [{pipeline_mode = #tpu.pipeline_mode<synchronous>, transform_indices = @transform_0, window_bounds = array<i64: 16, 16>}, {pipeline_mode = #tpu.pipeline_mode<synchronous>, transform_indices = @transform_1, window_bounds = array<i64: 16, 128>}, {transform_indices = @transform_2, window_bounds = array<i64: 1, 32, 128>}, {transform_indices = @transform_3, window_bounds = array<i64: 1, 32, 128>}, {transform_indices = @transform_4, window_bounds = array<i64: 1, 1, 128>}, {pipeline_mode = #tpu.pipeline_mode<synchronous>, transform_indices = @transform_5, window_bounds = array<i64: 2, 32>}]} {
    %c0 = arith.constant 0 : index
    %c0_0 = arith.constant 0 : index
    %c0_1 = arith.constant 0 : index
    %0 = vector.load %arg5[%c0, %c0_0, %c0_1] : memref<1x1x128xf32, #tpu.memory_space<vmem>>, vector<1x1x128xf32>
    %1 = vector.shape_cast %0 : vector<1x1x128xf32> to vector<1x128xf32>
    %c0_i32 = arith.constant 0 : i32
    %2 = arith.cmpi eq, %arg0, %c0_i32 : i32
    %3 = arith.extui %2 : i1 to i32
    %c0_i32_2 = arith.constant 0 : i32
    %4 = arith.cmpi ne, %3, %c0_i32_2 : i32
    scf.if %4 {
      %c0_68 = arith.constant 0 : index
      %c0_69 = arith.constant 0 : index
      %245 = vector.load %arg1[%c0_68, %c0_69] : memref<16x16xf32, #tpu.memory_space<vmem>>, vector<16x16xf32>
      %c0_70 = arith.constant 0 : index
      %c0_71 = arith.constant 0 : index
      %246 = vector.load %arg2[%c0_70, %c0_71] : memref<16x128xf32, #tpu.memory_space<vmem>>, vector<16x128xf32>
      %cst_72 = arith.constant dense<0.000000e+00> : vector<16x128xf32>
      %247 = tpu.matmul %245, %246, %cst_72 {dimension_numbers = #tpu.dot_dimension_numbers<[1], [0], [0], [1], [0, 0, 1, 1], [], []>} : vector<16x16xf32>, vector<16x128xf32>, vector<16x128xf32> -> vector<16x128xf32>
      %248 = vector.broadcast %1 : vector<1x128xf32> to vector<16x128xf32>
      %249 = arith.addf %247, %248 : vector<16x128xf32>
      %c0_73 = arith.constant 0 : index
      %c0_74 = arith.constant 0 : index
      %250 = vector.load %arg8[%c0_73, %c0_74] : memref<16x128xf32, #tpu.memory_space<vmem>>, vector<16x128xf32>
      tpu.vector_store %arg8[%c0_73, %c0_74], %249 {strides = array<i32>} : memref<16x128xf32, #tpu.memory_space<vmem>>, vector<16x128xf32>,
    } else {
    }
    %c0_i32_3 = arith.constant 0 : i32
    %5 = arith.cmpi sgt, %arg0, %c0_i32_3 : i32
    %6 = arith.extui %5 : i1 to i32
    %c0_i32_4 = arith.constant 0 : i32
    %7 = arith.cmpi ne, %6, %c0_i32_4 : i32
    scf.if %7 {
      %c0_68 = arith.constant 0 : index
      %c0_69 = arith.constant 0 : index
      %245 = vector.load %arg7[%c0_68, %c0_69] : memref<16x32xf32, #tpu.memory_space<vmem>>, vector<16x32xf32>
      %c0_70 = arith.constant 0 : index
      %c0_71 = arith.constant 0 : index
      %c0_72 = arith.constant 0 : index
      %246 = vector.load %arg3[%c0_70, %c0_71, %c0_72] : memref<1x32x128xf32, #tpu.memory_space<vmem>>, vector<1x32x128xf32>
      %247 = vector.shape_cast %246 : vector<1x32x128xf32> to vector<32x128xf32>
      %cst_73 = arith.constant dense<0.000000e+00> : vector<16x128xf32>
      %248 = tpu.matmul %245, %247, %cst_73 {dimension_numbers = #tpu.dot_dimension_numbers<[1], [0], [0], [1], [0, 0, 1, 1], [], []>} : vector<16x32xf32>, vector<32x128xf32>, vector<16x128xf32> -> vector<16x128xf32>
      %249 = vector.broadcast %1 : vector<1x128xf32> to vector<16x128xf32>
      %250 = arith.addf %248, %249 : vector<16x128xf32>
      %c0_74 = arith.constant 0 : index
      %c0_75 = arith.constant 0 : index
      %251 = vector.load %arg8[%c0_74, %c0_75] : memref<16x128xf32, #tpu.memory_space<vmem>>, vector<16x128xf32>
      tpu.vector_store %arg8[%c0_74, %c0_75], %250 {strides = array<i32>} : memref<16x128xf32, #tpu.memory_space<vmem>>, vector<16x128xf32>,
    } else {
    }
    %c0_5 = arith.constant 0 : index
    %c0_6 = arith.constant 0 : index
    %c0_7 = arith.constant 0 : index
    %8 = vector.load %arg4[%c0_5, %c0_6, %c0_7] : memref<1x32x128xf32, #tpu.memory_space<vmem>>, vector<1x32x128xf32>
    %9 = vector.shape_cast %8 : vector<1x32x128xf32> to vector<32x128xf32>
    %cst = arith.constant 0.000000e+00 : f32
    %10 = vector.broadcast %cst : f32 to vector<2x32xf32>
    %cst_8 = arith.constant 0.000000e+00 : f32
    %11 = vector.broadcast %cst_8 : f32 to vector<2x32xf32>
    %c0_9 = arith.constant 0 : index
    %c0_10 = arith.constant 0 : index
    %12 = vector.load %arg8[%c0_9, %c0_10] : memref<16x128xf32, #tpu.memory_space<vmem>>, vector<2x128xf32>
    %cst_11 = arith.constant dense<0.000000e+00> : vector<2x128xf32>
    %13 = tpu.matmul %10, %9, %cst_11 {dimension_numbers = #tpu.dot_dimension_numbers<[1], [0], [0], [1], [0, 0, 1, 1], [], []>} : vector<2x32xf32>, vector<32x128xf32>, vector<2x128xf32> -> vector<2x128xf32>
    %14 = arith.addf %12, %13 : vector<2x128xf32>
    %15 = vector.extract_strided_slice %14 {offsets = [0, 0], sizes = [2, 32], strides = [1, 1]} : vector<2x128xf32> to vector<2x32xf32>
    %16 = arith.negf %15 : vector<2x32xf32>
    %17 = math.exp %16 : vector<2x32xf32>
    %cst_12 = arith.constant 1.000000e+00 : f32
    %18 = vector.broadcast %cst_12 : f32 to vector<2x32xf32>
    %19 = arith.addf %18, %17 : vector<2x32xf32>
    %20 = arith.divf %18, %19 : vector<2x32xf32>
    %21 = vector.extract_strided_slice %14 {offsets = [0, 32], sizes = [2, 32], strides = [1, 1]} : vector<2x128xf32> to vector<2x32xf32>
    %22 = arith.negf %21 : vector<2x32xf32>
    %23 = math.exp %22 : vector<2x32xf32>
    %cst_13 = arith.constant 1.000000e+00 : f32
    %24 = vector.broadcast %cst_13 : f32 to vector<2x32xf32>
    %25 = arith.addf %24, %23 : vector<2x32xf32>
    %26 = arith.divf %24, %25 : vector<2x32xf32>
    %27 = vector.extract_strided_slice %14 {offsets = [0, 64], sizes = [2, 32], strides = [1, 1]} : vector<2x128xf32> to vector<2x32xf32>
    %28 = math.tanh %27 : vector<2x32xf32>
    %29 = vector.extract_strided_slice %14 {offsets = [0, 96], sizes = [2, 32], strides = [1, 1]} : vector<2x128xf32> to vector<2x32xf32>
    %30 = arith.negf %29 : vector<2x32xf32>
    %31 = math.exp %30 : vector<2x32xf32>
    %cst_14 = arith.constant 1.000000e+00 : f32
    %32 = vector.broadcast %cst_14 : f32 to vector<2x32xf32>
    %33 = arith.addf %32, %31 : vector<2x32xf32>
    %34 = arith.divf %32, %33 : vector<2x32xf32>
    %35 = arith.mulf %26, %11 : vector<2x32xf32>
    %36 = arith.mulf %20, %28 : vector<2x32xf32>
    %37 = arith.addf %35, %36 : vector<2x32xf32>
    %38 = math.tanh %37 : vector<2x32xf32>
    %39 = arith.mulf %34, %38 : vector<2x32xf32>
    %c0_15 = arith.constant 0 : index
    %c0_16 = arith.constant 0 : index
    %40 = vector.load %arg7[%c0_15, %c0_16] : memref<16x32xf32, #tpu.memory_space<vmem>>, vector<2x32xf32>
    tpu.vector_store %arg7[%c0_15, %c0_16], %39 {strides = array<i32>} : memref<16x32xf32, #tpu.memory_space<vmem>>, vector<2x32xf32>,
    %c2 = arith.constant 2 : index
    %c0_17 = arith.constant 0 : index
    %41 = vector.load %arg8[%c2, %c0_17] : memref<16x128xf32, #tpu.memory_space<vmem>>, vector<2x128xf32>
    %cst_18 = arith.constant dense<0.000000e+00> : vector<2x128xf32>
    %42 = tpu.matmul %39, %9, %cst_18 {dimension_numbers = #tpu.dot_dimension_numbers<[1], [0], [0], [1], [0, 0, 1, 1], [], []>} : vector<2x32xf32>, vector<32x128xf32>, vector<2x128xf32> -> vector<2x128xf32>
    %43 = arith.addf %41, %42 : vector<2x128xf32>
    %44 = vector.extract_strided_slice %43 {offsets = [0, 0], sizes = [2, 32], strides = [1, 1]} : vector<2x128xf32> to vector<2x32xf32>
    %45 = arith.negf %44 : vector<2x32xf32>
    %46 = math.exp %45 : vector<2x32xf32>
    %cst_19 = arith.constant 1.000000e+00 : f32
    %47 = vector.broadcast %cst_19 : f32 to vector<2x32xf32>
    %48 = arith.addf %47, %46 : vector<2x32xf32>
    %49 = arith.divf %47, %48 : vector<2x32xf32>
    %50 = vector.extract_strided_slice %43 {offsets = [0, 32], sizes = [2, 32], strides = [1, 1]} : vector<2x128xf32> to vector<2x32xf32>
    %51 = arith.negf %50 : vector<2x32xf32>
    %52 = math.exp %51 : vector<2x32xf32>
    %cst_20 = arith.constant 1.000000e+00 : f32
    %53 = vector.broadcast %cst_20 : f32 to vector<2x32xf32>
    %54 = arith.addf %53, %52 : vector<2x32xf32>
    %55 = arith.divf %53, %54 : vector<2x32xf32>
    %56 = vector.extract_strided_slice %43 {offsets = [0, 64], sizes = [2, 32], strides = [1, 1]} : vector<2x128xf32> to vector<2x32xf32>
    %57 = math.tanh %56 : vector<2x32xf32>
    %58 = vector.extract_strided_slice %43 {offsets = [0, 96], sizes = [2, 32], strides = [1, 1]} : vector<2x128xf32> to vector<2x32xf32>
    %59 = arith.negf %58 : vector<2x32xf32>
    %60 = math.exp %59 : vector<2x32xf32>
    %cst_21 = arith.constant 1.000000e+00 : f32
    %61 = vector.broadcast %cst_21 : f32 to vector<2x32xf32>
    %62 = arith.addf %61, %60 : vector<2x32xf32>
    %63 = arith.divf %61, %62 : vector<2x32xf32>
    %64 = arith.mulf %55, %37 : vector<2x32xf32>
    %65 = arith.mulf %49, %57 : vector<2x32xf32>
    %66 = arith.addf %64, %65 : vector<2x32xf32>
    %67 = math.tanh %66 : vector<2x32xf32>
    %68 = arith.mulf %63, %67 : vector<2x32xf32>
    %c2_22 = arith.constant 2 : index
    %c0_23 = arith.constant 0 : index
    %69 = vector.load %arg7[%c2_22, %c0_23] : memref<16x32xf32, #tpu.memory_space<vmem>>, vector<2x32xf32>
    tpu.vector_store %arg7[%c2_22, %c0_23], %68 {strides = array<i32>} : memref<16x32xf32, #tpu.memory_space<vmem>>, vector<2x32xf32>,
    %c4 = arith.constant 4 : index
    %c0_24 = arith.constant 0 : index
    %70 = vector.load %arg8[%c4, %c0_24] : memref<16x128xf32, #tpu.memory_space<vmem>>, vector<2x128xf32>
    %cst_25 = arith.constant dense<0.000000e+00> : vector<2x128xf32>
    %71 = tpu.matmul %68, %9, %cst_25 {dimension_numbers = #tpu.dot_dimension_numbers<[1], [0], [0], [1], [0, 0, 1, 1], [], []>} : vector<2x32xf32>, vector<32x128xf32>, vector<2x128xf32> -> vector<2x128xf32>
    %72 = arith.addf %70, %71 : vector<2x128xf32>
    %73 = vector.extract_strided_slice %72 {offsets = [0, 0], sizes = [2, 32], strides = [1, 1]} : vector<2x128xf32> to vector<2x32xf32>
    %74 = arith.negf %73 : vector<2x32xf32>
    %75 = math.exp %74 : vector<2x32xf32>
    %cst_26 = arith.constant 1.000000e+00 : f32
    %76 = vector.broadcast %cst_26 : f32 to vector<2x32xf32>
    %77 = arith.addf %76, %75 : vector<2x32xf32>
    %78 = arith.divf %76, %77 : vector<2x32xf32>
    %79 = vector.extract_strided_slice %72 {offsets = [0, 32], sizes = [2, 32], strides = [1, 1]} : vector<2x128xf32> to vector<2x32xf32>
    %80 = arith.negf %79 : vector<2x32xf32>
    %81 = math.exp %80 : vector<2x32xf32>
    %cst_27 = arith.constant 1.000000e+00 : f32
    %82 = vector.broadcast %cst_27 : f32 to vector<2x32xf32>
    %83 = arith.addf %82, %81 : vector<2x32xf32>
    %84 = arith.divf %82, %83 : vector<2x32xf32>
    %85 = vector.extract_strided_slice %72 {offsets = [0, 64], sizes = [2, 32], strides = [1, 1]} : vector<2x128xf32> to vector<2x32xf32>
    %86 = math.tanh %85 : vector<2x32xf32>
    %87 = vector.extract_strided_slice %72 {offsets = [0, 96], sizes = [2, 32], strides = [1, 1]} : vector<2x128xf32> to vector<2x32xf32>
    %88 = arith.negf %87 : vector<2x32xf32>
    %89 = math.exp %88 : vector<2x32xf32>
    %cst_28 = arith.constant 1.000000e+00 : f32
    %90 = vector.broadcast %cst_28 : f32 to vector<2x32xf32>
    %91 = arith.addf %90, %89 : vector<2x32xf32>
    %92 = arith.divf %90, %91 : vector<2x32xf32>
    %93 = arith.mulf %84, %66 : vector<2x32xf32>
    %94 = arith.mulf %78, %86 : vector<2x32xf32>
    %95 = arith.addf %93, %94 : vector<2x32xf32>
    %96 = math.tanh %95 : vector<2x32xf32>
    %97 = arith.mulf %92, %96 : vector<2x32xf32>
    %c4_29 = arith.constant 4 : index
    %c0_30 = arith.constant 0 : index
    %98 = vector.load %arg7[%c4_29, %c0_30] : memref<16x32xf32, #tpu.memory_space<vmem>>, vector<2x32xf32>
    tpu.vector_store %arg7[%c4_29, %c0_30], %97 {strides = array<i32>} : memref<16x32xf32, #tpu.memory_space<vmem>>, vector<2x32xf32>,
    %c6 = arith.constant 6 : index
    %c0_31 = arith.constant 0 : index
    %99 = vector.load %arg8[%c6, %c0_31] : memref<16x128xf32, #tpu.memory_space<vmem>>, vector<2x128xf32>
    %cst_32 = arith.constant dense<0.000000e+00> : vector<2x128xf32>
    %100 = tpu.matmul %97, %9, %cst_32 {dimension_numbers = #tpu.dot_dimension_numbers<[1], [0], [0], [1], [0, 0, 1, 1], [], []>} : vector<2x32xf32>, vector<32x128xf32>, vector<2x128xf32> -> vector<2x128xf32>
    %101 = arith.addf %99, %100 : vector<2x128xf32>
    %102 = vector.extract_strided_slice %101 {offsets = [0, 0], sizes = [2, 32], strides = [1, 1]} : vector<2x128xf32> to vector<2x32xf32>
    %103 = arith.negf %102 : vector<2x32xf32>
    %104 = math.exp %103 : vector<2x32xf32>
    %cst_33 = arith.constant 1.000000e+00 : f32
    %105 = vector.broadcast %cst_33 : f32 to vector<2x32xf32>
    %106 = arith.addf %105, %104 : vector<2x32xf32>
    %107 = arith.divf %105, %106 : vector<2x32xf32>
    %108 = vector.extract_strided_slice %101 {offsets = [0, 32], sizes = [2, 32], strides = [1, 1]} : vector<2x128xf32> to vector<2x32xf32>
    %109 = arith.negf %108 : vector<2x32xf32>
    %110 = math.exp %109 : vector<2x32xf32>
    %cst_34 = arith.constant 1.000000e+00 : f32
    %111 = vector.broadcast %cst_34 : f32 to vector<2x32xf32>
    %112 = arith.addf %111, %110 : vector<2x32xf32>
    %113 = arith.divf %111, %112 : vector<2x32xf32>
    %114 = vector.extract_strided_slice %101 {offsets = [0, 64], sizes = [2, 32], strides = [1, 1]} : vector<2x128xf32> to vector<2x32xf32>
    %115 = math.tanh %114 : vector<2x32xf32>
    %116 = vector.extract_strided_slice %101 {offsets = [0, 96], sizes = [2, 32], strides = [1, 1]} : vector<2x128xf32> to vector<2x32xf32>
    %117 = arith.negf %116 : vector<2x32xf32>
    %118 = math.exp %117 : vector<2x32xf32>
    %cst_35 = arith.constant 1.000000e+00 : f32
    %119 = vector.broadcast %cst_35 : f32 to vector<2x32xf32>
    %120 = arith.addf %119, %118 : vector<2x32xf32>
    %121 = arith.divf %119, %120 : vector<2x32xf32>
    %122 = arith.mulf %113, %95 : vector<2x32xf32>
    %123 = arith.mulf %107, %115 : vector<2x32xf32>
    %124 = arith.addf %122, %123 : vector<2x32xf32>
    %125 = math.tanh %124 : vector<2x32xf32>
    %126 = arith.mulf %121, %125 : vector<2x32xf32>
    %c6_36 = arith.constant 6 : index
    %c0_37 = arith.constant 0 : index
    %127 = vector.load %arg7[%c6_36, %c0_37] : memref<16x32xf32, #tpu.memory_space<vmem>>, vector<2x32xf32>
    tpu.vector_store %arg7[%c6_36, %c0_37], %126 {strides = array<i32>} : memref<16x32xf32, #tpu.memory_space<vmem>>, vector<2x32xf32>,
    %c8 = arith.constant 8 : index
    %c0_38 = arith.constant 0 : index
    %128 = vector.load %arg8[%c8, %c0_38] : memref<16x128xf32, #tpu.memory_space<vmem>>, vector<2x128xf32>
    %cst_39 = arith.constant dense<0.000000e+00> : vector<2x128xf32>
    %129 = tpu.matmul %126, %9, %cst_39 {dimension_numbers = #tpu.dot_dimension_numbers<[1], [0], [0], [1], [0, 0, 1, 1], [], []>} : vector<2x32xf32>, vector<32x128xf32>, vector<2x128xf32> -> vector<2x128xf32>
    %130 = arith.addf %128, %129 : vector<2x128xf32>
    %131 = vector.extract_strided_slice %130 {offsets = [0, 0], sizes = [2, 32], strides = [1, 1]} : vector<2x128xf32> to vector<2x32xf32>
    %132 = arith.negf %131 : vector<2x32xf32>
    %133 = math.exp %132 : vector<2x32xf32>
    %cst_40 = arith.constant 1.000000e+00 : f32
    %134 = vector.broadcast %cst_40 : f32 to vector<2x32xf32>
    %135 = arith.addf %134, %133 : vector<2x32xf32>
    %136 = arith.divf %134, %135 : vector<2x32xf32>
    %137 = vector.extract_strided_slice %130 {offsets = [0, 32], sizes = [2, 32], strides = [1, 1]} : vector<2x128xf32> to vector<2x32xf32>
    %138 = arith.negf %137 : vector<2x32xf32>
    %139 = math.exp %138 : vector<2x32xf32>
    %cst_41 = arith.constant 1.000000e+00 : f32
    %140 = vector.broadcast %cst_41 : f32 to vector<2x32xf32>
    %141 = arith.addf %140, %139 : vector<2x32xf32>
    %142 = arith.divf %140, %141 : vector<2x32xf32>
    %143 = vector.extract_strided_slice %130 {offsets = [0, 64], sizes = [2, 32], strides = [1, 1]} : vector<2x128xf32> to vector<2x32xf32>
    %144 = math.tanh %143 : vector<2x32xf32>
    %145 = vector.extract_strided_slice %130 {offsets = [0, 96], sizes = [2, 32], strides = [1, 1]} : vector<2x128xf32> to vector<2x32xf32>
    %146 = arith.negf %145 : vector<2x32xf32>
    %147 = math.exp %146 : vector<2x32xf32>
    %cst_42 = arith.constant 1.000000e+00 : f32
    %148 = vector.broadcast %cst_42 : f32 to vector<2x32xf32>
    %149 = arith.addf %148, %147 : vector<2x32xf32>
    %150 = arith.divf %148, %149 : vector<2x32xf32>
    %151 = arith.mulf %142, %124 : vector<2x32xf32>
    %152 = arith.mulf %136, %144 : vector<2x32xf32>
    %153 = arith.addf %151, %152 : vector<2x32xf32>
    %154 = math.tanh %153 : vector<2x32xf32>
    %155 = arith.mulf %150, %154 : vector<2x32xf32>
    %c8_43 = arith.constant 8 : index
    %c0_44 = arith.constant 0 : index
    %156 = vector.load %arg7[%c8_43, %c0_44] : memref<16x32xf32, #tpu.memory_space<vmem>>, vector<2x32xf32>
    tpu.vector_store %arg7[%c8_43, %c0_44], %155 {strides = array<i32>} : memref<16x32xf32, #tpu.memory_space<vmem>>, vector<2x32xf32>,
    %c10 = arith.constant 10 : index
    %c0_45 = arith.constant 0 : index
    %157 = vector.load %arg8[%c10, %c0_45] : memref<16x128xf32, #tpu.memory_space<vmem>>, vector<2x128xf32>
    %cst_46 = arith.constant dense<0.000000e+00> : vector<2x128xf32>
    %158 = tpu.matmul %155, %9, %cst_46 {dimension_numbers = #tpu.dot_dimension_numbers<[1], [0], [0], [1], [0, 0, 1, 1], [], []>} : vector<2x32xf32>, vector<32x128xf32>, vector<2x128xf32> -> vector<2x128xf32>
    %159 = arith.addf %157, %158 : vector<2x128xf32>
    %160 = vector.extract_strided_slice %159 {offsets = [0, 0], sizes = [2, 32], strides = [1, 1]} : vector<2x128xf32> to vector<2x32xf32>
    %161 = arith.negf %160 : vector<2x32xf32>
    %162 = math.exp %161 : vector<2x32xf32>
    %cst_47 = arith.constant 1.000000e+00 : f32
    %163 = vector.broadcast %cst_47 : f32 to vector<2x32xf32>
    %164 = arith.addf %163, %162 : vector<2x32xf32>
    %165 = arith.divf %163, %164 : vector<2x32xf32>
    %166 = vector.extract_strided_slice %159 {offsets = [0, 32], sizes = [2, 32], strides = [1, 1]} : vector<2x128xf32> to vector<2x32xf32>
    %167 = arith.negf %166 : vector<2x32xf32>
    %168 = math.exp %167 : vector<2x32xf32>
    %cst_48 = arith.constant 1.000000e+00 : f32
    %169 = vector.broadcast %cst_48 : f32 to vector<2x32xf32>
    %170 = arith.addf %169, %168 : vector<2x32xf32>
    %171 = arith.divf %169, %170 : vector<2x32xf32>
    %172 = vector.extract_strided_slice %159 {offsets = [0, 64], sizes = [2, 32], strides = [1, 1]} : vector<2x128xf32> to vector<2x32xf32>
    %173 = math.tanh %172 : vector<2x32xf32>
    %174 = vector.extract_strided_slice %159 {offsets = [0, 96], sizes = [2, 32], strides = [1, 1]} : vector<2x128xf32> to vector<2x32xf32>
    %175 = arith.negf %174 : vector<2x32xf32>
    %176 = math.exp %175 : vector<2x32xf32>
    %cst_49 = arith.constant 1.000000e+00 : f32
    %177 = vector.broadcast %cst_49 : f32 to vector<2x32xf32>
    %178 = arith.addf %177, %176 : vector<2x32xf32>
    %179 = arith.divf %177, %178 : vector<2x32xf32>
    %180 = arith.mulf %171, %153 : vector<2x32xf32>
    %181 = arith.mulf %165, %173 : vector<2x32xf32>
    %182 = arith.addf %180, %181 : vector<2x32xf32>
    %183 = math.tanh %182 : vector<2x32xf32>
    %184 = arith.mulf %179, %183 : vector<2x32xf32>
    %c10_50 = arith.constant 10 : index
    %c0_51 = arith.constant 0 : index
    %185 = vector.load %arg7[%c10_50, %c0_51] : memref<16x32xf32, #tpu.memory_space<vmem>>, vector<2x32xf32>
    tpu.vector_store %arg7[%c10_50, %c0_51], %184 {strides = array<i32>} : memref<16x32xf32, #tpu.memory_space<vmem>>, vector<2x32xf32>,
    %c12 = arith.constant 12 : index
    %c0_52 = arith.constant 0 : index
    %186 = vector.load %arg8[%c12, %c0_52] : memref<16x128xf32, #tpu.memory_space<vmem>>, vector<2x128xf32>
    %cst_53 = arith.constant dense<0.000000e+00> : vector<2x128xf32>
    %187 = tpu.matmul %184, %9, %cst_53 {dimension_numbers = #tpu.dot_dimension_numbers<[1], [0], [0], [1], [0, 0, 1, 1], [], []>} : vector<2x32xf32>, vector<32x128xf32>, vector<2x128xf32> -> vector<2x128xf32>
    %188 = arith.addf %186, %187 : vector<2x128xf32>
    %189 = vector.extract_strided_slice %188 {offsets = [0, 0], sizes = [2, 32], strides = [1, 1]} : vector<2x128xf32> to vector<2x32xf32>
    %190 = arith.negf %189 : vector<2x32xf32>
    %191 = math.exp %190 : vector<2x32xf32>
    %cst_54 = arith.constant 1.000000e+00 : f32
    %192 = vector.broadcast %cst_54 : f32 to vector<2x32xf32>
    %193 = arith.addf %192, %191 : vector<2x32xf32>
    %194 = arith.divf %192, %193 : vector<2x32xf32>
    %195 = vector.extract_strided_slice %188 {offsets = [0, 32], sizes = [2, 32], strides = [1, 1]} : vector<2x128xf32> to vector<2x32xf32>
    %196 = arith.negf %195 : vector<2x32xf32>
    %197 = math.exp %196 : vector<2x32xf32>
    %cst_55 = arith.constant 1.000000e+00 : f32
    %198 = vector.broadcast %cst_55 : f32 to vector<2x32xf32>
    %199 = arith.addf %198, %197 : vector<2x32xf32>
    %200 = arith.divf %198, %199 : vector<2x32xf32>
    %201 = vector.extract_strided_slice %188 {offsets = [0, 64], sizes = [2, 32], strides = [1, 1]} : vector<2x128xf32> to vector<2x32xf32>
    %202 = math.tanh %201 : vector<2x32xf32>
    %203 = vector.extract_strided_slice %188 {offsets = [0, 96], sizes = [2, 32], strides = [1, 1]} : vector<2x128xf32> to vector<2x32xf32>
    %204 = arith.negf %203 : vector<2x32xf32>
    %205 = math.exp %204 : vector<2x32xf32>
    %cst_56 = arith.constant 1.000000e+00 : f32
    %206 = vector.broadcast %cst_56 : f32 to vector<2x32xf32>
    %207 = arith.addf %206, %205 : vector<2x32xf32>
    %208 = arith.divf %206, %207 : vector<2x32xf32>
    %209 = arith.mulf %200, %182 : vector<2x32xf32>
    %210 = arith.mulf %194, %202 : vector<2x32xf32>
    %211 = arith.addf %209, %210 : vector<2x32xf32>
    %212 = math.tanh %211 : vector<2x32xf32>
    %213 = arith.mulf %208, %212 : vector<2x32xf32>
    %c12_57 = arith.constant 12 : index
    %c0_58 = arith.constant 0 : index
    %214 = vector.load %arg7[%c12_57, %c0_58] : memref<16x32xf32, #tpu.memory_space<vmem>>, vector<2x32xf32>
    tpu.vector_store %arg7[%c12_57, %c0_58], %213 {strides = array<i32>} : memref<16x32xf32, #tpu.memory_space<vmem>>, vector<2x32xf32>,
    %c14 = arith.constant 14 : index
    %c0_59 = arith.constant 0 : index
    %215 = vector.load %arg8[%c14, %c0_59] : memref<16x128xf32, #tpu.memory_space<vmem>>, vector<2x128xf32>
    %cst_60 = arith.constant dense<0.000000e+00> : vector<2x128xf32>
    %216 = tpu.matmul %213, %9, %cst_60 {dimension_numbers = #tpu.dot_dimension_numbers<[1], [0], [0], [1], [0, 0, 1, 1], [], []>} : vector<2x32xf32>, vector<32x128xf32>, vector<2x128xf32> -> vector<2x128xf32>
    %217 = arith.addf %215, %216 : vector<2x128xf32>
    %218 = vector.extract_strided_slice %217 {offsets = [0, 0], sizes = [2, 32], strides = [1, 1]} : vector<2x128xf32> to vector<2x32xf32>
    %219 = arith.negf %218 : vector<2x32xf32>
    %220 = math.exp %219 : vector<2x32xf32>
    %cst_61 = arith.constant 1.000000e+00 : f32
    %221 = vector.broadcast %cst_61 : f32 to vector<2x32xf32>
    %222 = arith.addf %221, %220 : vector<2x32xf32>
    %223 = arith.divf %221, %222 : vector<2x32xf32>
    %224 = vector.extract_strided_slice %217 {offsets = [0, 32], sizes = [2, 32], strides = [1, 1]} : vector<2x128xf32> to vector<2x32xf32>
    %225 = arith.negf %224 : vector<2x32xf32>
    %226 = math.exp %225 : vector<2x32xf32>
    %cst_62 = arith.constant 1.000000e+00 : f32
    %227 = vector.broadcast %cst_62 : f32 to vector<2x32xf32>
    %228 = arith.addf %227, %226 : vector<2x32xf32>
    %229 = arith.divf %227, %228 : vector<2x32xf32>
    %230 = vector.extract_strided_slice %217 {offsets = [0, 64], sizes = [2, 32], strides = [1, 1]} : vector<2x128xf32> to vector<2x32xf32>
    %231 = math.tanh %230 : vector<2x32xf32>
    %232 = vector.extract_strided_slice %217 {offsets = [0, 96], sizes = [2, 32], strides = [1, 1]} : vector<2x128xf32> to vector<2x32xf32>
    %233 = arith.negf %232 : vector<2x32xf32>
    %234 = math.exp %233 : vector<2x32xf32>
    %cst_63 = arith.constant 1.000000e+00 : f32
    %235 = vector.broadcast %cst_63 : f32 to vector<2x32xf32>
    %236 = arith.addf %235, %234 : vector<2x32xf32>
    %237 = arith.divf %235, %236 : vector<2x32xf32>
    %238 = arith.mulf %229, %211 : vector<2x32xf32>
    %239 = arith.mulf %223, %231 : vector<2x32xf32>
    %240 = arith.addf %238, %239 : vector<2x32xf32>
    %241 = math.tanh %240 : vector<2x32xf32>
    %242 = arith.mulf %237, %241 : vector<2x32xf32>
    %c14_64 = arith.constant 14 : index
    %c0_65 = arith.constant 0 : index
    %243 = vector.load %arg7[%c14_64, %c0_65] : memref<16x32xf32, #tpu.memory_space<vmem>>, vector<2x32xf32>
    tpu.vector_store %arg7[%c14_64, %c0_65], %242 {strides = array<i32>} : memref<16x32xf32, #tpu.memory_space<vmem>>, vector<2x32xf32>,
    %c0_66 = arith.constant 0 : index
    %c0_67 = arith.constant 0 : index
    %244 = vector.load %arg6[%c0_66, %c0_67] : memref<2x32xf32, #tpu.memory_space<vmem>>, vector<2x32xf32>
    tpu.vector_store %arg6[%c0_66, %c0_67], %242 {strides = array<i32>} : memref<2x32xf32, #tpu.memory_space<vmem>>, vector<2x32xf32>,
    return
  }
  func.func @transform_0(%arg0: i32) -> (i32, i32) {
    %c0_i32 = arith.constant 0 : i32
    %c0_i32_0 = arith.constant 0 : i32
    %c0_i32_1 = arith.constant 0 : i32
    return %c0_i32, %c0_i32_0 : i32, i32
  }
  func.func @transform_1(%arg0: i32) -> (i32, i32) {
    %c0_i32 = arith.constant 0 : i32
    %c0_i32_0 = arith.constant 0 : i32
    %c0_i32_1 = arith.constant 0 : i32
    return %c0_i32, %c0_i32_0 : i32, i32
  }
  func.func @transform_2(%arg0: i32) -> (i32, i32, i32) {
    %c1_i32 = arith.constant 1 : i32
    %0 = arith.subi %arg0, %c1_i32 : i32
    %c0_i32 = arith.constant 0 : i32
    %1 = arith.maxsi %0, %c0_i32 : i32
    %c0_i32_0 = arith.constant 0 : i32
    %c0_i32_1 = arith.constant 0 : i32
    %c0_i32_2 = arith.constant 0 : i32
    return %1, %c0_i32_0, %c0_i32_1 : i32, i32, i32
  }
  func.func @transform_3(%arg0: i32) -> (i32, i32, i32) {
    %c0_i32 = arith.constant 0 : i32
    %c0_i32_0 = arith.constant 0 : i32
    %c0_i32_1 = arith.constant 0 : i32
    return %arg0, %c0_i32, %c0_i32_0 : i32, i32, i32
  }
  func.func @transform_4(%arg0: i32) -> (i32, i32, i32) {
    %c0_i32 = arith.constant 0 : i32
    %c0_i32_0 = arith.constant 0 : i32
    %c0_i32_1 = arith.constant 0 : i32
    return %arg0, %c0_i32, %c0_i32_0 : i32, i32, i32
  }
  func.func @transform_5(%arg0: i32) -> (i32, i32) {
    %c0_i32 = arith.constant 0 : i32
    %c0_i32_0 = arith.constant 0 : i32
    %c0_i32_1 = arith.constant 0 : i32
    return %c0_i32, %c0_i32_0 : i32, i32
  }
}

</mosaic_0001>

<bundles_post_ra>
// kernel: five_layer_lstm_net.1
= control target key start
LH: loop header
LB: loop body
LE: loop exit
PB: predicated region body
PF: predicated region fallthrough
CT: control target
= control target key end

     0   :  { %10 = vsyncpa [#allocation5], 0  ;;  %s2261_s0 = inlined_call_operand.vmem [shape: f32[16,16], index: 0, kind: input, shape index: {}]   ;;  %s2262_s1 = inlined_call_operand.vmem [shape: f32[16,128], index: 1, kind: input, shape index: {}]   ;;  %s2263_s2 = inlined_call_operand.hbm [shape: f32[4,32,128], index: 2, kind: input, shape index: {}]   ;;  %s2264_s3 = inlined_call_operand.hbm [shape: f32[5,32,128], index: 3, kind: input, shape index: {}]   ;;  %s2265_s4 = inlined_call_operand.vmem [shape: f32[5,1,128], index: 4, kind: input, shape index: {}]   ;;  %s2266_s5 = inlined_call_operand.vmem [shape: f32[2,32], index: 5, kind: output, shape index: {}]  }
   0x1   :  { %12 = vsyncpa [#allocation5 + $0x1], 0 }
   0x2   :  { %13 = vsyncpa [#allocation7], 0 }
   0x3   :  { %15 = vsyncpa [#allocation7 + $0x1], 0  ;;  %s1890_s18 = smov 0   ;;  %s1892_s19 = smov 0  }
   0x4   :  { %s1894_s20 = smov 0   ;;  %s1896_s21 = smov 0  }
   0x5   :  { %s1898_s22 = smov 0   ;;  %s1900_s23 = smov 0  }
   0x6   :  { %s1902_s24 = smov 0  }
   0x7 LB: > { %s1922_s25 = sadd.s32 4294967295, %s1850_s24   ;;  %s1925_s26 = sadd.s32 1, %s1850_s24   ;;  %s1850_s24 = sphi %s1902_s24, %s2292_s24   ;;  %s1846_s23 = sphi %s1900_s23, %s2291_s23   ;;  %s1842_s22 = sphi %s1898_s22, %s2290_s22   ;;  %s1838_s21 = sphi %s1896_s21, %s2289_s21   ;;  %s1834_s20 = sphi %s1894_s20, %s2288_s20   ;;  %s1830_s19 = sphi %s1892_s19, %s2287_s19   ;;  %s1826_s18 = sphi %s1890_s18, %s2286_s18  }
   0x8   : > { %p68_p0 = scmp.gt.s32.totalorder %s1922_s25, 0  ;;  %s1400_s27 = sadd.s32 4294967295, %s1925_s26 }
   0x9   : > { %p71_p1 = scmp.gt.s32.totalorder %s1400_s27, 0  ;;  %s76_s28 = sadd.s32 1, %s1846_s23 }
   0xa   : > { %s69_s29 = scalar_select %p68_p0, %s1922_s25, 0 }
   0xb   : > { %s2294_s27 = smov (!%p71_p1, %s1400_s27), 0  ;;  %p83_p2 = scmp.ne.s32.totalorder %s1846_s23, %s1842_s22 }
   0xc   : > { %p2268_p3 = scmp.eq.s32.totalorder %s1850_s24, 0  ;;  %s73_s30 = ssub.s32 %s69_s29, %s2294_s27 }
   0xd   : > { %p89_p4 = scmp.ne.s32.totalorder %s1842_s22, %s1838_s21  ;;  %p74_p5 = scmp.eq.s32.totalorder %s73_s30, 0 }
   0xe   : > { %p1937_p6 = por %p2268_p3, %p83_p2  ;;  %p90_p7 = scmp.eq.s32.totalorder %s1922_s25, 0 }
   0xf   : > { %s99_s7 = ssub.s32 %s1850_s24, %s1925_s26  ;;  %p115_p10 = scmp.ne.s32.totalorder %s1830_s19, %s1826_s18 }
  0x10   : > { %s1945_s8 = scalar_select %p74_p5, %s1846_s23, %s76_s28  }
  0x11   : > { %p1947_p8 = por %p90_p7, %p89_p4  ;;  %p1951_p9 = scmp.eq.s32.totalorder %s99_s7, 0 }
  0x12   : > { %p2267_p11 = scmp.lt.s32.totalorder %s1850_s24, 5  ;;  %s192_s11 = sand.u32 1, %s1846_s23  }
  0x13   : > { %s2273_s9 = scalar_select %p1947_p8, 1, 0 }
  0x14   : > { %s2274_s10 = scalar_select %p1951_p9, 1, 0 }
  0x15   : > { %p1958_p12 = por %p115_p10, %p90_p7  ;;  %s1403_s13 = sshll.u32 %s192_s11, 5 }
  0x16   : > { %s1436_s14 = sshll.u32 %s69_s29, 9  ;;  %s196_s21 = scalar_lea.vmem [#allocation4], %s1403_s13 }
  0x17   : > { %s2275_s12 = scalar_select %p1958_p12, 1, 0 }
  0x18   : > { %s1965_s17 = scalar_lea.hbm %s2263_s2, %s1436_s14  ;;  %s206_s27 = sshll.u32 %s196_s21, 4  ;;  %s1975_s27 = int_to_ptr.vmem [resolvable:$true] %s206_s27 }
  0x19   : > { %p1971_p13 = pnand %p2267_p11, %p1937_p6  ;;  %s1977_s28 = scalar_lea.sflag [#allocation5], %s192_s11 }
  0x1a   : > { %s1732_s29 = scalar_lea.hbm %s1965_s17, 512  ;;  %s1737_s6 = scalar_lea.hbm %s2263_s2, 2048 }
  0x1b   : > { %p1733_p0 = scmp.ne.s32.totalorder %s1965_s17, %s1732_s29  ;;  %p1734_p1 = pneg %p1971_p13 }
  0x1c   : > { %p1738_p5 = scmp.lt.s32.totalorder %s1965_s17, %s2263_s2  ;;  %p1739_p6 = scmp.lt.s32.totalorder %s1737_s6, %s1732_s29 }
  0x1d   : > { %p1735_p2 = pnand %p1734_p1, %p1733_p0 }
  0x1e   : > { %p1740_p7 = por %p1739_p6, %p1738_p5 }
  0x1f   : > { %p1736_p4 = pneg %p1735_p2 }
  0x21   : > { %p1741_p10 = pnand %p1740_p7, %p1736_p4 }
  0x23   : > { %1744 = shalt.err (!%p1741_p10)
}
  0x24   : > { %s1745_s11 = scalar_lea.vmem %s1975_s27, 512  ;;  %s1852_s15 = smov [#allocation4]  }
  0x25   : > { %p1746_p11 = scmp.ne.s32.totalorder %s1975_s27, %s1745_s11  ;;  %s1750_s16 = sshll.u32 %s1852_s15, 4  ;;  %s1751_s16 = int_to_ptr.vmem [resolvable:$false] %s1750_s16 }
  0x26   : > { %s1752_s21 = scalar_lea.vmem %s1751_s16, 1024  ;;  %p1753_p2 = scmp.lt.s32.totalorder %s1975_s27, %s1751_s16 }
  0x27   : > { %p1748_p3 = pnand %p1746_p11, %p1734_p1  ;;  %p1754_p12 = scmp.lt.s32.totalorder %s1752_s21, %s1745_s11 }
  0x29   : > { %p1749_p0 = pneg %p1748_p3  ;;  %p1755_p8 = por %p1754_p12, %p1753_p2 }
  0x2b   : > { %p1756_p9 = pnand %p1755_p8, %p1749_p0 }
  0x2d   : > { %1759 = shalt.err (!%p1756_p9)
}
  0x2e   : > { %s2271_s29 = smov 128   ;;  %s1854_s30 = smov 8  }
  0x2f   : > { %1601 = dma.hbm_to_vmem [thread:$0]  (!%p1971_p13), %s1965_s17, 512, %s1975_s27, %s1977_s28, %s2271_s29, %s2271_s29, %s1854_s30  }
  0x30   : > { %p1410_p3 = scmp.ge.s32.totalorder %s1850_s24, 1  ;;  %p241_p8 = scmp.lt.s32.totalorder %s1850_s24, 6 }
  0x31   : > { %s1437_s7 = sshll.u32 %s1850_s24, 9  ;;  %s102_s13 = sadd.s32 1, %s1834_s20 }
  0x32   : > { %p2004_p9 = pnand %p1410_p3, %p241_p8  ;;  %p109_p11 = scmp.ne.s32.totalorder %s1834_s20, %s1830_s19 }
  0x33   : > { %p2278_p12 = scmp.ne.s32.totalorder %s2274_s10, 0  ;;  %p2279_p1 = scmp.eq.s32.totalorder %s1850_s24, 0 }
  0x34   : > { %s2277_s6 = scalar_select %p2004_p9, 1, 0 }
  0x35   : > { %s2014_s14 = scalar_select %p2278_p12, %s1834_s20, %s102_s13  }
  0x36   : > { %p111_p4 = por %p109_p11, %p2279_p1  ;;  %s216_s11 = sand.u32 1, %s1834_s20  }
  0x37   : > { %s1407_s18 = sshll.u32 %s216_s11, 5  ;;  %s2022_s17 = scalar_lea.hbm %s2264_s3, %s1437_s7 }
  0x38   : > { %s220_s27 = scalar_lea.vmem [#allocation6], %s1407_s18  ;;  %p2280_p13 = scmp.lt.s32.totalorder %s1850_s24, 5 }
  0x39   : > { %s227_s28 = sshll.u32 %s220_s27, 4  ;;  %s2032_s10 = scalar_lea.sflag [#allocation7], %s216_s11  ;;  %s2030_s28 = int_to_ptr.vmem [resolvable:$true] %s227_s28 }
  0x3a   : > { %p2026_p5 = pnand %p2280_p13, %p111_p4  ;;  %s1760_s13 = scalar_lea.hbm %s2022_s17, 512 }
  0x3b   : > { %p1761_p6 = scmp.ne.s32.totalorder %s2022_s17, %s1760_s13  ;;  %s1765_s18 = scalar_lea.hbm %s2264_s3, 2560 }
  0x3c   : > { %p1762_p7 = pneg %p2026_p5  ;;  %p1766_p2 = scmp.lt.s32.totalorder %s2022_s17, %s2264_s3 }
  0x3d   : > { %p1767_p3 = scmp.lt.s32.totalorder %s1765_s18, %s1760_s13 }
  0x3e   : > { %p1763_p10 = pnand %p1762_p7, %p1761_p6 }
  0x3f   : > { %p1768_p8 = por %p1767_p3, %p1766_p2 }
  0x40   : > { %p1764_p0 = pneg %p1763_p10 }
  0x42   : > { %p1769_p11 = pnand %p1768_p8, %p1764_p0 }
  0x44   : > { %1772 = shalt.err (!%p1769_p11)
}
  0x45   : > { %s1773_s11 = scalar_lea.vmem %s2030_s28, 512  ;;  %s1855_s27 = smov [#allocation6]  }
  0x46   : > { %p1774_p12 = scmp.ne.s32.totalorder %s2030_s28, %s1773_s11  ;;  %s1778_s29 = sshll.u32 %s1855_s27, 4  ;;  %s1779_s29 = int_to_ptr.vmem [resolvable:$false] %s1778_s29 }
  0x47   : > { %s1780_s7 = scalar_lea.vmem %s1779_s29, 1024  ;;  %p1781_p13 = scmp.lt.s32.totalorder %s2030_s28, %s1779_s29 }
  0x48   : > { %p1776_p1 = pnand %p1774_p12, %p1762_p7  ;;  %p1782_p6 = scmp.lt.s32.totalorder %s1780_s7, %s1773_s11 }
  0x4a   : > { %p1777_p4 = pneg %p1776_p1  ;;  %p1783_p10 = por %p1782_p6, %p1781_p13 }
  0x4c   : > { %p1784_p9 = pnand %p1783_p10, %p1777_p4 }
  0x4e   : > { %1787 = shalt.err (!%p1784_p9)
}
  0x4f   : > { %s2282_s13 = smov 128   ;;  %p2283_p7 = scmp.ne.s32.totalorder %s2277_s6, 0 }
  0x50   : > { %1604 = dma.hbm_to_vmem [thread:$0]  (!%p2026_p5), %s2022_s17, 512, %s2030_s28, %s2032_s10, %s2282_s13, %s2282_s13, %s1854_s30  }
  0x51   : > { %245 = sbr.rel (%p2283_p7) target bundleno = 6038 (0x1796), region = 40  ;;  %s247_s15 = sand.u32 (!%p2283_p7), 1, %s1842_s22  }
  0x52   : > { %s1411_s29 = sshll.u32 (!%p2283_p7), %s247_s15, 5  ;;  %s248_s18 = scalar_lea.sflag (!%p2283_p7), [#allocation5], %s247_s15 }
  0x53   : > { %s2059_s24 = scalar_lea.vmem (!%p2283_p7), [#allocation4], %s1411_s29  ;;  %p2284_p9 = scmp.ne.s32.totalorder (!%p2283_p7), %s2273_s9, 0 }
  0x56   : > { %1817 = dma.done.wait (%p2284_p9), %s248_s18, 512  }
  0x57   : > { %1819 = vsyncadd (%p2284_p9), %s248_s18, 4294966784  ;;  %s256_s21 = sand.u32 1, %s1830_s19   ;;  %p2285_p5 = scmp.ne.s32.totalorder %s2275_s12, 0 }
  0x58   : > { %s1412_s16 = sshll.u32 %s256_s21, 5  ;;  %s257_s30 = scalar_lea.sflag [#allocation7], %s256_s21 }
  0x59   : > { %s2066_s17 = scalar_lea.vmem [#allocation6], %s1412_s16 }
  0x5a   : > { %1821 = dma.done.wait (%p2285_p5), %s257_s30, 512  }
  0x5b   : > { %1823 = vsyncadd (%p2285_p5), %s257_s30, 4294966784  ;;  %p293_p0 = scmp.lt.s32.totalorder %s1922_s25, 4  ;;  %p1413_p2 = scmp.ne.s32.totalorder %s1922_s25, 0 }
  0x5d   : > { %s294_s6 = scalar_select %p293_p0, %s1922_s25, 4 }
  0x5e   : > { %300 = sbr.rel (%p1413_p2) target bundleno = 302 (0x12e), region = 52 }
  0x5f   : > { %s295_s9 = scalar_lea.vmem %s2265_s4, %s294_s6 }
  0x60   : > { %v296_v0 = vld [vmem:[%s295_s9] sm:$0x1] }
  0x63   : > { %v304_v1 = vld [vmem:[%s2262_s1 + $0x8] sm:$0xff]  ;;  %v303_v2 = vld [vmem:[%s2262_s1] sm:$0xff]  ;;  %vm311_vm0 = vcmask 130048   ;;  %v306_v5 = vlaneseq }
  0x64   : > { %v301_v3 = vld [vmem:[%s2261_s0] sm:$0xff]  ;;  %1488 = vmatprep.subr.mxu0 %v304_v1  ;;  %v302_v4 = vld [vmem:[%s2261_s0 + $0x8] sm:$0xff] }
  0x65   : > { %1492 = vmatprep.mubr.msk.f32.mxu0 %vm311_vm0, %v301_v3  ;;  %1489 = vmatpush3.msra.mxu0 %v304_v1  ;;  %v307_v6 = vshrl.u32 %v306_v5, 7 }
  0x66   : > { %1490 = vmatprep.subr.mxu0 %v303_v2 }
  0x67   : > { %1491 = vmatpush3.msra.mxu0 %v303_v2  ;;  %v308_v7 = vsub.s32 0, %v307_v6 }
  0x68   : > { %1493 = vmatmul.mubr.msk.f32.vlgmr.msra.gmra.mxu0 %vm311_vm0, %v302_v4 }
  0x69   : > { %v309_v8 = vrot.slane %v296_v0, %v308_v7 }
 0x128   : > { %v1494_v9 = vpop.f32.mrf.mxu0 }
 0x129   : > { %v390_v10 = vadd.f32 %v1494_v9, %v309_v8 }
 0x12a   : > { %v384_v11 = vpop.f32.mrf.mxu0 }
 0x12b   : > { %394 = vst [vmem:[#allocation3 + $0x8] sm:$0xff] %v390_v10  ;;  %v385_v12 = vadd.f32 %v384_v11, %v309_v8 }
 0x12d   : > { %393 = vst [vmem:[#allocation3] sm:$0xff] %v385_v12 }
 0x12e PF: > { %p1416_p3 = scmp.le.s32.totalorder %s1922_s25, 0 }
 0x130   : > { %398 = sbr.rel (%p1416_p3) target bundleno = 516 (0x204), region = 56 }
 0x135   : > { %v404_v13 = vld [vmem:[%s2059_s24 + $0x18] sm:$0xff]  ;;  %v403_v14 = vld [vmem:[%s2059_s24 + $0x10] sm:$0xff]  ;;  %vm411_vm1 = vcmask 261120   ;;  %v399_v15 = vld [vmem:[#allocation2] sm:$0xff]  ;;  %v406_v19 = vlaneseq }
 0x136   : > { %1495 = vmatprep.subr.mxu0 %v404_v13  ;;  %v402_v16 = vld [vmem:[%s2059_s24 + $0x8] sm:$0xff]  ;;  %1503 = vmatprep.mubr.msk.f32.mxu0 %vm411_vm1, %v399_v15  ;;  %v401_v17 = vld [vmem:[%s2059_s24] sm:$0xff] }
 0x137   : > { %1496 = vmatpush3.msra.mxu0 %v404_v13  ;;  %v400_v18 = vld [vmem:[#allocation2 + $0x8] sm:$0xff]  ;;  %v407_v20 = vshrl.u32 %v406_v19, 7 }
 0x138   : > { %1497 = vmatprep.subr.mxu0 %v403_v14 }
 0x139   : > { %1498 = vmatpush3.msra.mxu0 %v403_v14  ;;  %v408_v21 = vsub.s32 0, %v407_v20 }
 0x13a   : > { %1499 = vmatprep.subr.mxu0 %v402_v16 }
 0x13b   : > { %1500 = vmatpush3.msra.mxu0 %v402_v16  ;;  %v409_v22 = vrot.slane %v296_v0, %v408_v21 }
 0x13c   : > { %1501 = vmatprep.subr.mxu0 %v401_v17 }
 0x13d   : > { %1502 = vmatpush3.msra.mxu0 %v401_v17 }
 0x13e   : > { %1504 = vmatmul.mubr.msk.f32.vlgmr.msra.gmra.mxu0 %vm411_vm1, %v400_v18 }
 0x1fe   : > { %v1505_v23 = vpop.f32.mrf.mxu0 }
 0x1ff   : > { %v490_v24 = vadd.f32 %v1505_v23, %v409_v22 }
 0x200   : > { %v484_v25 = vpop.f32.mrf.mxu0 }
 0x201   : > { %494 = vst [vmem:[#allocation3 + $0x8] sm:$0xff] %v490_v24  ;;  %v485_v26 = vadd.f32 %v484_v25, %v409_v22 }
 0x203   : > { %493 = vst [vmem:[#allocation3] sm:$0xff] %v485_v26 }
 0x204 PF: > { %v2096_v27 = vld [vmem:[%s2066_s17 + $0x18] sm:$0xff]  ;;  %v1856_v28 = vmov 0.0   ;;  %v2100_v29 = vld [vmem:[%s2066_s17 + $0x10] sm:$0xff]  ;;  %vm1857_vm2 = vmmov 0   ;;  %v2108_v30 = vld [vmem:[%s2066_s17 + $0x8] sm:$0xff]  ;;  %s1858_s25 = smov 64  }
 0x205   : > { %1506 = vmatprep.subr.mxu0 %v1856_v28  ;;  %1514 = vmatprep.mubr.msk.f32.mxu0 %vm1857_vm2, %v1856_v28  ;;  %v2115_v31 = vld [vmem:[%s2066_s17] sm:$0xff]  ;;  %s1859_s24 = smov 32   ;;  %vm603_vm3 = vcmask 254976   ;;  %vm500_vm4 = vcmask 261120  }
 0x206   : > { %1507 = vmatpush3.msra.mxu0 %v2096_v27  ;;  %1517 = vmatprep.subr.mxu1 %v1856_v28 }
 0x207   : > { %1508 = vmatprep.subr.mxu0 %v1856_v28  ;;  %1518 = vmatpush3.msra.mxu1 %v2096_v27 }
 0x208   : > { %1509 = vmatpush3.msra.mxu0 %v2100_v29  ;;  %1519 = vmatprep.subr.mxu1 %v1856_v28 }
 0x209   : > { %1510 = vmatprep.subr.mxu0 %v1856_v28  ;;  %1520 = vmatpush3.msra.mxu1 %v2100_v29 }
 0x20a   : > { %1511 = vmatpush3.msra.mxu0 %v2108_v30  ;;  %1521 = vmatprep.subr.mxu1 %v1856_v28  ;;  %v499_v32 = vld [vmem:[#allocation3] sm:$0x3]  ;;  %v605_v50 = vld [vmem:[#allocation3 + $0x2] sm:$0x3]  ;;  %v708_v4 = vld [vmem:[#allocation3 + $0x4] sm:$0x3] }
 0x20b   : > { %1512 = vmatprep.subr.mxu0 %v1856_v28  ;;  %1522 = vmatpush3.msra.mxu1 %v2108_v30  ;;  %v811_v22 = vld [vmem:[#allocation3 + $0x6] sm:$0x3] }
 0x20c   : > { %1513 = vmatpush3.msra.mxu0 %v2115_v31  ;;  %1523 = vmatprep.subr.mxu1 %v1856_v28 }
 0x20d   : > { %1515 = vmatmul.mubr.f32.vlgmr.msra.gmra.mxu0 %v1856_v28  ;;  %1524 = vmatpush3.msra.mxu1 %v2115_v31 }
 0x20e   : > { %1525 = vmatprep.mubr.msk.f32.mxu1 %vm1857_vm2, %v1856_v28  ;;  %1528 = vmatprep.subr.mxu0 %v1856_v28 }
 0x20f   : > { %1529 = vmatpush3.msra.mxu0 %v2096_v27  ;;  %1536 = vmatprep.mubr.msk.f32.mxu0 %vm1857_vm2, %v1856_v28 }
 0x210   : > { %1530 = vmatprep.subr.mxu0 %v1856_v28  ;;  %1539 = vmatprep.subr.mxu1 %v1856_v28 }
 0x211   : > { %1531 = vmatpush3.msra.mxu0 %v2100_v29 }
 0x212   : > { %1532 = vmatprep.subr.mxu0 %v1856_v28 }
 0x213   : > { %1533 = vmatpush3.msra.mxu0 %v2108_v30 }
 0x214   : > { %1534 = vmatprep.subr.mxu0 %v1856_v28 }
 0x215   : > { %1535 = vmatpush3.msra.mxu0 %v2115_v31 }
 0x216   : > { %1550 = vmatprep.subr.mxu0 %v1856_v28 }
 0x2cd   : > { %v570_v33 = vpop.f32.mrf.mxu0 }
 0x2ce   : > { %v574_v34 = vadd.f32 %v570_v33, %v499_v32 }
 0x2cf   : > { %v1516_v35 = vpop.f32.mrf.mxu0 }
 0x2d0   : > { %1668 = vtanh.f32 %v574_v34  ;;  %v1419_v37 = vmul.f32 -1.442695, %v574_v34 }
 0x2d2   : > { %1670 = vpow2.f32 %v1419_v37 }
 0x2dd   : > { %v1669_v36 = vpop.eup %1668 }
 0x2de   : > { %584 = vrot.lane.b32.xlu0 %v1669_v36, %s1858_s25 }
 0x2df   : > { %v1671_v38 = vpop.eup %1670 }
 0x2e0   : > { %v578_v39 = vadd.f32 1.0, %v1671_v38 }
 0x2e2   : > { %1672 = vrcp.f32 %v578_v39 }
 0x2ef   : > { %v1673_v40 = vpop.eup %1672 }
 0x2f0   : > { %v582_v43 = vmul.f32 0.0, %v1673_v40 }
 0x350   : > { %v585_v41 = vpop.permute.xlu0 %584 }
 0x351   : > { %v587_v42 = vmul.f32 %v1673_v40, %v585_v41 }
 0x353   : > { %589 = vrot.lane.b32.xlu0 %v587_v42, %s1859_s24 }
 0x3c5   : > { %v590_v44 = vpop.permute.xlu0 %589 }
 0x3c6   : > { %v592_v45 = vadd.f32 %v590_v44, %v582_v43 }
 0x3c8   : > { %1674 = vtanh.f32 %v592_v45 }
 0x3d5   : > { %v1675_v46 = vpop.eup %1674 }
 0x3d6   : > { %595 = vrot.lane.b32.xlu1 %v1675_v46, %s1858_s25 }
 0x448   : > { %v596_v47 = vpop.permute.xlu1 %595 }
 0x449   : > { %v598_v48 = vmul.f32 %v1673_v40, %v596_v47 }
 0x44b   : > { %600 = vrot.lane.b32.xlu1 %v598_v48, %s1859_s24 }
 0x4bd   : > { %v601_v49 = vpop.permute.xlu1 %600 }
 0x4be   : > { %604 = vst.msk [vmem:[#allocation2] sm:$0x3] %vm603_vm3, %v601_v49  ;;  %1526 = vmatmul.mubr.msk.f32.vlgmr.msra.gmra.mxu1 %vm500_vm4, %v601_v49 }
 0x4bf   : > { %1540 = vmatpush3.msra.mxu1 %v2096_v27  ;;  %1547 = vmatprep.mubr.msk.f32.mxu1 %vm1857_vm2, %v1856_v28 }
 0x4c0   : > { %1541 = vmatprep.subr.mxu1 %v1856_v28 }
 0x4c1   : > { %1542 = vmatpush3.msra.mxu1 %v2100_v29 }
 0x4c2   : > { %1543 = vmatprep.subr.mxu1 %v1856_v28 }
 0x4c3   : > { %1544 = vmatpush3.msra.mxu1 %v2108_v30 }
 0x4c4   : > { %1545 = vmatprep.subr.mxu1 %v1856_v28 }
 0x4c5   : > { %1546 = vmatpush3.msra.mxu1 %v2115_v31 }
 0x4c6   : > { %1561 = vmatprep.subr.mxu1 %v1856_v28 }
 0x57e   : > { %v674_v51 = vpop.f32.mrf.mxu1 }
 0x57f   : > { %v678_v52 = vadd.f32 %v674_v51, %v605_v50 }
 0x580   : > { %v1527_v53 = vpop.f32.mrf.mxu1 }
 0x581   : > { %1676 = vtanh.f32 %v678_v52  ;;  %v1421_v55 = vmul.f32 -1.442695, %v678_v52 }
 0x583   : > { %1678 = vpow2.f32 %v1421_v55 }
 0x58e   : > { %v1677_v54 = vpop.eup %1676 }
 0x58f   : > { %688 = vrot.lane.b32.xlu0 %v1677_v54, %s1858_s25 }
 0x590   : > { %v1679_v56 = vpop.eup %1678 }
 0x591   : > { %v682_v57 = vadd.f32 1.0, %v1679_v56 }
 0x593   : > { %1680 = vrcp.f32 %v682_v57 }
 0x5a0   : > { %v1681_v58 = vpop.eup %1680 }
 0x5a1   : > { %v686_v61 = vmul.f32 %v1681_v58, %v592_v45  ;;  %v914_v45 = vld [vmem:[#allocation3 + $0x8] sm:$0x3] }
 0x601   : > { %v689_v59 = vpop.permute.xlu0 %688 }
 0x602   : > { %v691_v60 = vmul.f32 %v1681_v58, %v689_v59 }
 0x604   : > { %693 = vrot.lane.b32.xlu1 %v691_v60, %s1859_s24 }
 0x676   : > { %v694_v62 = vpop.permute.xlu1 %693 }
 0x677   : > { %v696_v63 = vadd.f32 %v694_v62, %v686_v61 }
 0x679   : > { %1682 = vtanh.f32 %v696_v63 }
 0x686   : > { %v1683_v0 = vpop.eup %1682 }
 0x687   : > { %699 = vrot.lane.b32.xlu0 %v1683_v0, %s1858_s25 }
 0x6f9   : > { %v700_v1 = vpop.permute.xlu0 %699 }
 0x6fa   : > { %v702_v2 = vmul.f32 %v1681_v58, %v700_v1 }
 0x6fc   : > { %704 = vrot.lane.b32.xlu1 %v702_v2, %s1859_s24 }
 0x76e   : > { %v705_v3 = vpop.permute.xlu1 %704 }
 0x76f   : > { %707 = vst.msk [vmem:[#allocation2 + $0x2] sm:$0x3] %vm603_vm3, %v705_v3  ;;  %1537 = vmatmul.mubr.msk.f32.vlgmr.msra.gmra.mxu0 %vm500_vm4, %v705_v3 }
 0x770   : > { %1551 = vmatpush3.msra.mxu0 %v2096_v27  ;;  %1558 = vmatprep.mubr.msk.f32.mxu0 %vm1857_vm2, %v1856_v28 }
 0x771   : > { %1552 = vmatprep.subr.mxu0 %v1856_v28 }
 0x772   : > { %1553 = vmatpush3.msra.mxu0 %v2100_v29 }
 0x773   : > { %1554 = vmatprep.subr.mxu0 %v1856_v28 }
 0x774   : > { %1555 = vmatpush3.msra.mxu0 %v2108_v30 }
 0x775   : > { %1556 = vmatprep.subr.mxu0 %v1856_v28 }
 0x776   : > { %1557 = vmatpush3.msra.mxu0 %v2115_v31 }
 0x777   : > { %1572 = vmatprep.subr.mxu0 %v1856_v28 }
 0x82f   : > { %v777_v5 = vpop.f32.mrf.mxu0 }
 0x830   : > { %v781_v6 = vadd.f32 %v777_v5, %v708_v4 }
 0x831   : > { %v1538_v7 = vpop.f32.mrf.mxu0 }
 0x832   : > { %1684 = vtanh.f32 %v781_v6  ;;  %v1423_v9 = vmul.f32 -1.442695, %v781_v6 }
 0x834   : > { %1686 = vpow2.f32 %v1423_v9 }
 0x83f   : > { %v1685_v8 = vpop.eup %1684 }
 0x840   : > { %791 = vrot.lane.b32.xlu0 %v1685_v8, %s1858_s25 }
 0x841   : > { %v1687_v10 = vpop.eup %1686 }
 0x842   : > { %v785_v11 = vadd.f32 1.0, %v1687_v10 }
 0x844   : > { %1688 = vrcp.f32 %v785_v11 }
 0x851   : > { %v1689_v12 = vpop.eup %1688 }
 0x852   : > { %v789_v15 = vmul.f32 %v1689_v12, %v696_v63  ;;  %v1017_v63 = vld [vmem:[#allocation3 + $0xa] sm:$0x3] }
 0x8b2   : > { %v792_v13 = vpop.permute.xlu0 %791 }
 0x8b3   : > { %v794_v14 = vmul.f32 %v1689_v12, %v792_v13 }
 0x8b5   : > { %796 = vrot.lane.b32.xlu1 %v794_v14, %s1859_s24 }
 0x927   : > { %v797_v16 = vpop.permute.xlu1 %796 }
 0x928   : > { %v799_v17 = vadd.f32 %v797_v16, %v789_v15 }
 0x92a   : > { %1690 = vtanh.f32 %v799_v17 }
 0x937   : > { %v1691_v18 = vpop.eup %1690 }
 0x938   : > { %802 = vrot.lane.b32.xlu0 %v1691_v18, %s1858_s25 }
 0x9aa   : > { %v803_v19 = vpop.permute.xlu0 %802 }
 0x9ab   : > { %v805_v20 = vmul.f32 %v1689_v12, %v803_v19  ;;  %v1120_v12 = vld [vmem:[#allocation3 + $0xc] sm:$0x3] }
 0x9ad   : > { %807 = vrot.lane.b32.xlu1 %v805_v20, %s1859_s24 }
 0xa1f   : > { %v808_v21 = vpop.permute.xlu1 %807 }
 0xa20   : > { %810 = vst.msk [vmem:[#allocation2 + $0x4] sm:$0x3] %vm603_vm3, %v808_v21  ;;  %1548 = vmatmul.mubr.msk.f32.vlgmr.msra.gmra.mxu1 %vm500_vm4, %v808_v21 }
 0xa21   : > { %1562 = vmatpush3.msra.mxu1 %v2096_v27  ;;  %1569 = vmatprep.mubr.msk.f32.mxu1 %vm1857_vm2, %v1856_v28 }
 0xa22   : > { %1563 = vmatprep.subr.mxu1 %v1856_v28 }
 0xa23   : > { %1564 = vmatpush3.msra.mxu1 %v2100_v29 }
 0xa24   : > { %1565 = vmatprep.subr.mxu1 %v1856_v28 }
 0xa25   : > { %1566 = vmatpush3.msra.mxu1 %v2108_v30 }
 0xa26   : > { %1567 = vmatprep.subr.mxu1 %v1856_v28 }
 0xa27   : > { %1568 = vmatpush3.msra.mxu1 %v2115_v31 }
 0xa28   : > { %1583 = vmatprep.subr.mxu1 %v1856_v28 }
 0xae0   : > { %v880_v23 = vpop.f32.mrf.mxu1 }
 0xae1   : > { %v884_v24 = vadd.f32 %v880_v23, %v811_v22 }
 0xae2   : > { %v1549_v25 = vpop.f32.mrf.mxu1 }
 0xae3   : > { %1692 = vtanh.f32 %v884_v24  ;;  %v1425_v32 = vmul.f32 -1.442695, %v884_v24 }
 0xae5   : > { %1694 = vpow2.f32 %v1425_v32 }
 0xaf0   : > { %v1693_v26 = vpop.eup %1692 }
 0xaf1   : > { %894 = vrot.lane.b32.xlu0 %v1693_v26, %s1858_s25 }
 0xaf2   : > { %v1695_v33 = vpop.eup %1694 }
 0xaf3   : > { %v888_v34 = vadd.f32 1.0, %v1695_v33 }
 0xaf5   : > { %1696 = vrcp.f32 %v888_v34 }
 0xb02   : > { %v1697_v35 = vpop.eup %1696 }
 0xb03   : > { %v892_v38 = vmul.f32 %v1697_v35, %v799_v17 }
 0xb63   : > { %v895_v36 = vpop.permute.xlu0 %894 }
 0xb64   : > { %v897_v37 = vmul.f32 %v1697_v35, %v895_v36 }
 0xb66   : > { %899 = vrot.lane.b32.xlu1 %v897_v37, %s1859_s24 }
 0xbd8   : > { %v900_v39 = vpop.permute.xlu1 %899 }
 0xbd9   : > { %v902_v40 = vadd.f32 %v900_v39, %v892_v38 }
 0xbdb   : > { %1698 = vtanh.f32 %v902_v40 }
 0xbe8   : > { %v1699_v41 = vpop.eup %1698 }
 0xbe9   : > { %905 = vrot.lane.b32.xlu0 %v1699_v41, %s1858_s25 }
 0xc5b   : > { %v906_v42 = vpop.permute.xlu0 %905 }
 0xc5c   : > { %v908_v43 = vmul.f32 %v1697_v35, %v906_v42  ;;  %v1223_v35 = vld [vmem:[#allocation3 + $0xe] sm:$0x3] }
 0xc5e   : > { %910 = vrot.lane.b32.xlu1 %v908_v43, %s1859_s24 }
 0xcd0   : > { %v911_v44 = vpop.permute.xlu1 %910 }
 0xcd1   : > { %913 = vst.msk [vmem:[#allocation2 + $0x6] sm:$0x3] %vm603_vm3, %v911_v44  ;;  %1559 = vmatmul.mubr.msk.f32.vlgmr.msra.gmra.mxu0 %vm500_vm4, %v911_v44 }
 0xcd2   : > { %1573 = vmatpush3.msra.mxu0 %v2096_v27  ;;  %1580 = vmatprep.mubr.msk.f32.mxu0 %vm1857_vm2, %v1856_v28 }
 0xcd3   : > { %1574 = vmatprep.subr.mxu0 %v1856_v28 }
 0xcd4   : > { %1575 = vmatpush3.msra.mxu0 %v2100_v29 }
 0xcd5   : > { %1576 = vmatprep.subr.mxu0 %v1856_v28 }
 0xcd6   : > { %1577 = vmatpush3.msra.mxu0 %v2108_v30 }
 0xcd7   : > { %1578 = vmatprep.subr.mxu0 %v1856_v28 }
 0xcd8   : > { %1579 = vmatpush3.msra.mxu0 %v2115_v31 }
 0xd91   : > { %v983_v46 = vpop.f32.mrf.mxu0 }
 0xd92   : > { %v987_v47 = vadd.f32 %v983_v46, %v914_v45 }
 0xd93   : > { %v1560_v48 = vpop.f32.mrf.mxu0 }
 0xd94   : > { %1700 = vtanh.f32 %v987_v47  ;;  %v1427_v50 = vmul.f32 -1.442695, %v987_v47 }
 0xd96   : > { %1702 = vpow2.f32 %v1427_v50 }
 0xda1   : > { %v1701_v49 = vpop.eup %1700 }
 0xda2   : > { %997 = vrot.lane.b32.xlu0 %v1701_v49, %s1858_s25 }
 0xda3   : > { %v1703_v51 = vpop.eup %1702 }
 0xda4   : > { %v991_v52 = vadd.f32 1.0, %v1703_v51 }
 0xda6   : > { %1704 = vrcp.f32 %v991_v52 }
 0xdb3   : > { %v1705_v53 = vpop.eup %1704 }
 0xdb4   : > { %v995_v56 = vmul.f32 %v1705_v53, %v902_v40 }
 0xe14   : > { %v998_v54 = vpop.permute.xlu0 %997 }
 0xe15   : > { %v1000_v55 = vmul.f32 %v1705_v53, %v998_v54 }
 0xe17   : > { %1002 = vrot.lane.b32.xlu1 %v1000_v55, %s1859_s24 }
 0xe89   : > { %v1003_v57 = vpop.permute.xlu1 %1002 }
 0xe8a   : > { %v1005_v58 = vadd.f32 %v1003_v57, %v995_v56 }
 0xe8c   : > { %1706 = vtanh.f32 %v1005_v58 }
 0xe99   : > { %v1707_v59 = vpop.eup %1706 }
 0xe9a   : > { %1008 = vrot.lane.b32.xlu0 %v1707_v59, %s1858_s25 }
 0xf0c   : > { %v1009_v60 = vpop.permute.xlu0 %1008 }
 0xf0d   : > { %v1011_v61 = vmul.f32 %v1705_v53, %v1009_v60 }
 0xf0f   : > { %1013 = vrot.lane.b32.xlu1 %v1011_v61, %s1859_s24 }
 0xf81   : > { %v1014_v62 = vpop.permute.xlu1 %1013 }
 0xf82   : > { %1016 = vst.msk [vmem:[#allocation2 + $0x8] sm:$0x3] %vm603_vm3, %v1014_v62  ;;  %1570 = vmatmul.mubr.msk.f32.vlgmr.msra.gmra.mxu1 %vm500_vm4, %v1014_v62 }
 0xf83   : > { %1584 = vmatpush3.msra.mxu1 %v2096_v27  ;;  %1591 = vmatprep.mubr.msk.f32.mxu1 %vm1857_vm2, %v1856_v28 }
 0xf84   : > { %1585 = vmatprep.subr.mxu1 %v1856_v28 }
 0xf85   : > { %1586 = vmatpush3.msra.mxu1 %v2100_v29 }
 0xf86   : > { %1587 = vmatprep.subr.mxu1 %v1856_v28 }
 0xf87   : > { %1588 = vmatpush3.msra.mxu1 %v2108_v30 }
 0xf88   : > { %1589 = vmatprep.subr.mxu1 %v1856_v28 }
 0xf89   : > { %1590 = vmatpush3.msra.mxu1 %v2115_v31 }
0x1042   : > { %v1086_v0 = vpop.f32.mrf.mxu1 }
0x1043   : > { %v1090_v1 = vadd.f32 %v1086_v0, %v1017_v63 }
0x1044   : > { %v1571_v2 = vpop.f32.mrf.mxu1 }
0x1045   : > { %1708 = vtanh.f32 %v1090_v1  ;;  %v1429_v3 = vmul.f32 -1.442695, %v1090_v1 }
0x1047   : > { %1710 = vpow2.f32 %v1429_v3 }
0x1052   : > { %v1709_v27 = vpop.eup %1708 }
0x1053   : > { %1100 = vrot.lane.b32.xlu0 %v1709_v27, %s1858_s25 }
0x1054   : > { %v1711_v4 = vpop.eup %1710 }
0x1055   : > { %v1094_v29 = vadd.f32 1.0, %v1711_v4 }
0x1057   : > { %1712 = vrcp.f32 %v1094_v29 }
0x1064   : > { %v1713_v5 = vpop.eup %1712 }
0x1065   : > { %v1098_v28 = vmul.f32 %v1713_v5, %v1005_v58 }
0x10c5   : > { %v1101_v6 = vpop.permute.xlu0 %1100 }
0x10c6   : > { %v1103_v30 = vmul.f32 %v1713_v5, %v1101_v6 }
0x10c8   : > { %1105 = vrot.lane.b32.xlu1 %v1103_v30, %s1859_s24 }
0x113a   : > { %v1106_v31 = vpop.permute.xlu1 %1105 }
0x113b   : > { %v1108_v7 = vadd.f32 %v1106_v31, %v1098_v28 }
0x113d   : > { %1714 = vtanh.f32 %v1108_v7 }
0x114a   : > { %v1715_v8 = vpop.eup %1714 }
0x114b   : > { %1111 = vrot.lane.b32.xlu0 %v1715_v8, %s1858_s25 }
0x11bd   : > { %v1112_v9 = vpop.permute.xlu0 %1111 }
0x11be   : > { %v1114_v10 = vmul.f32 %v1713_v5, %v1112_v9 }
0x11c0   : > { %1116 = vrot.lane.b32.xlu1 %v1114_v10, %s1859_s24 }
0x1232   : > { %v1117_v11 = vpop.permute.xlu1 %1116 }
0x1233   : > { %1119 = vst.msk [vmem:[#allocation2 + $0xa] sm:$0x3] %vm603_vm3, %v1117_v11  ;;  %1581 = vmatmul.mubr.msk.f32.vlgmr.msra.gmra.mxu0 %vm500_vm4, %v1117_v11 }
0x12f3   : > { %v1189_v13 = vpop.f32.mrf.mxu0 }
0x12f4   : > { %v1193_v14 = vadd.f32 %v1189_v13, %v1120_v12 }
0x12f5   : > { %v1582_v15 = vpop.f32.mrf.mxu0 }
0x12f6   : > { %1716 = vtanh.f32 %v1193_v14  ;;  %v1431_v17 = vmul.f32 -1.442695, %v1193_v14 }
0x12f8   : > { %1718 = vpow2.f32 %v1431_v17 }
0x1303   : > { %v1717_v16 = vpop.eup %1716 }
0x1304   : > { %1203 = vrot.lane.b32.xlu0 %v1717_v16, %s1858_s25 }
0x1305   : > { %v1719_v18 = vpop.eup %1718 }
0x1306   : > { %v1197_v19 = vadd.f32 1.0, %v1719_v18 }
0x1308   : > { %1720 = vrcp.f32 %v1197_v19 }
0x1315   : > { %v1721_v20 = vpop.eup %1720 }
0x1316   : > { %v1201_v23 = vmul.f32 %v1721_v20, %v1108_v7 }
0x1376   : > { %v1204_v21 = vpop.permute.xlu0 %1203 }
0x1377   : > { %v1206_v22 = vmul.f32 %v1721_v20, %v1204_v21 }
0x1379   : > { %1208 = vrot.lane.b32.xlu1 %v1206_v22, %s1859_s24 }
0x13eb   : > { %v1209_v24 = vpop.permute.xlu1 %1208 }
0x13ec   : > { %v1211_v25 = vadd.f32 %v1209_v24, %v1201_v23 }
0x13ee   : > { %1722 = vtanh.f32 %v1211_v25 }
0x13fb   : > { %v1723_v26 = vpop.eup %1722 }
0x13fc   : > { %1214 = vrot.lane.b32.xlu0 %v1723_v26, %s1858_s25 }
0x146e   : > { %v1215_v32 = vpop.permute.xlu0 %1214 }
0x146f   : > { %v1217_v33 = vmul.f32 %v1721_v20, %v1215_v32 }
0x1471   : > { %1219 = vrot.lane.b32.xlu1 %v1217_v33, %s1859_s24 }
0x14e3   : > { %v1220_v34 = vpop.permute.xlu1 %1219 }
0x14e4   : > { %1222 = vst.msk [vmem:[#allocation2 + $0xc] sm:$0x3] %vm603_vm3, %v1220_v34  ;;  %1592 = vmatmul.mubr.msk.f32.vlgmr.msra.gmra.mxu1 %vm500_vm4, %v1220_v34 }
0x15a4   : > { %v1292_v36 = vpop.f32.mrf.mxu1 }
0x15a5   : > { %v1296_v37 = vadd.f32 %v1292_v36, %v1223_v35 }
0x15a6   : > { %v1593_v38 = vpop.f32.mrf.mxu1 }
0x15a7   : > { %1724 = vtanh.f32 %v1296_v37  ;;  %v1433_v40 = vmul.f32 -1.442695, %v1296_v37 }
0x15a9   : > { %1726 = vpow2.f32 %v1433_v40 }
0x15b4   : > { %v1725_v39 = vpop.eup %1724 }
0x15b5   : > { %1306 = vrot.lane.b32.xlu0 %v1725_v39, %s1858_s25 }
0x15b6   : > { %v1727_v41 = vpop.eup %1726 }
0x15b7   : > { %v1300_v42 = vadd.f32 1.0, %v1727_v41 }
0x15b9   : > { %1728 = vrcp.f32 %v1300_v42 }
0x15c6   : > { %v1729_v43 = vpop.eup %1728 }
0x15c7   : > { %v1304_v46 = vmul.f32 %v1729_v43, %v1211_v25 }
0x1627   : > { %v1307_v44 = vpop.permute.xlu0 %1306 }
0x1628   : > { %v1309_v45 = vmul.f32 %v1729_v43, %v1307_v44 }
0x162a   : > { %1311 = vrot.lane.b32.xlu1 %v1309_v45, %s1859_s24 }
0x169c   : > { %v1312_v47 = vpop.permute.xlu1 %1311 }
0x169d   : > { %v1314_v48 = vadd.f32 %v1312_v47, %v1304_v46 }
0x169f   : > { %1730 = vtanh.f32 %v1314_v48 }
0x16ac   : > { %v1731_v49 = vpop.eup %1730 }
0x16ad   : > { %1317 = vrot.lane.b32.xlu0 %v1731_v49, %s1858_s25 }
0x171f   : > { %v1318_v50 = vpop.permute.xlu0 %1317 }
0x1720   : > { %v1320_v51 = vmul.f32 %v1729_v43, %v1318_v50 }
0x1722   : > { %1322 = vrot.lane.b32.xlu1 %v1320_v51, %s1859_s24 }
0x1794   : > { %v1323_v52 = vpop.permute.xlu1 %1322 }
0x1795   : > { %1325 = vst.msk [vmem:[#allocation2 + $0xe] sm:$0x3] %vm603_vm3, %v1323_v52  ;;  %1326 = vst.msk [vmem:[%s2266_s5] sm:$0x3] %vm603_vm3, %v1323_v52 }
0x1796 PF: > { %p18_p8 = scmp.ge.s32.totalorder %s1925_s26, 7   ;;  %s2286_s18 = smov %s1830_s19 }
0x1797   : > { %s2287_s19 = smov %s1834_s20  ;;  %s2288_s20 = smov %s2014_s14 }
0x1798   : > { %s2289_s21 = smov %s1842_s22  ;;  %s2290_s22 = smov %s1846_s23 }
0x1799   : > { %s2291_s23 = smov %s1945_s8  ;;  %s2292_s24 = smov %s1925_s26 }
0x179a   :  { %20 = sbr.rel (!%p18_p8) target bundleno = 7 (0x7), region = 100 }
0x179f   :  { %1338 = vsyncpa [#allocation5], 1 }
0x17a0   :  { %1340 = vsyncpa [#allocation5 + $0x1], 1 }
0x17a1   :  { %1341 = vsyncpa [#allocation7], 1 }
0x17a2   :  { %1343 = vsyncpa [#allocation7 + $0x1], 1 }

</bundles_post_ra>
